<compile_context>
chip_gen: v6e
topology: v6e:2x2x1
jax: 0.10.0
libtpu: 0.0.40
codegen_flags: <defaults>
</compile_context>

<pallas_src>
import math

import jax
import jax.numpy as jnp
from jax.experimental import pallas as pl
from jax.experimental.pallas import tpu as pltpu  # noqa: F401  (TPU backend)

# ---- hyper-params (small, consistent with the module's __init__) -------------
MODEL_DIM = 32
INTER_DIM = 32          # must equal MODEL_DIM (see NOTE above)
NUM_HEADS = 2
K_DIM = 16
V_DIM = 16
SEQ = 8
BATCH = 2
EPS = 1e-5              # nn.LayerNorm default
BS = BATCH * SEQ
NEG = -1e10

# rows of the packed `vecs` array
IDX_BO1, IDX_BO2 = 0, 1
IDX_G1, IDX_BE1 = 2, 3
IDX_G2, IDX_BE2 = 4, 5
IDX_BF1, IDX_BF2 = 6, 7
IDX_G3, IDX_BE3 = 8, 9


def _dot(a, b):
    return jnp.dot(a, b, preferred_element_type=jnp.float32)


def _dot_t(a, b):
    # a @ b.T, contracting the last dim of both (no materialized transpose)
    return jax.lax.dot_general(a, b, (((1,), (1,)), ((), ())),
                               preferred_element_type=jnp.float32)


# ==============================================================================
# Pallas kernel (single gridless invocation; everything resident in VMEM)
# ==============================================================================
def decoder_layer_kernel(x_ref, enc_ref, bias_ref,
                         wx_ref, bx_ref, we_ref, be_ref,
                         wo_ref, wffn_ref, vecs_ref, out_ref):
    D = MODEL_DIM
    x2 = x_ref[...]            # (BS, D)   decoder input (flattened)
    enc2 = enc_ref[...]        # (BS, D)   encoder output (flattened)
    bias = bias_ref[...]       # (BS, BS)  additive mask (causal + batch block-diag)
    vecs = vecs_ref[...]       # (10, D)   packed biases / LN params

    def vrow(i):               # (1, D) row -> broadcasts over the BS rows
        return vecs[i:i + 1, :]

    def layer_norm(v, gi, bi):
        mean = jnp.mean(v, axis=-1, keepdims=True)
        var = jnp.mean((v - mean) ** 2, axis=-1, keepdims=True)
        return (v - mean) * jax.lax.rsqrt(var + EPS) * vrow(gi) + vrow(bi)

    # ---- fused full-width projections (2 MXU ops instead of 24 tiny ones) ----
    # xp lanes: [ Q_self | K_self | V_self | K_cross ]  -> (BS, 4*D) = (16, 128)
    xp = _dot(x2, wx_ref[...]) + bx_ref[...]
    # ep lanes: [ Q_cross | V_cross ]                    -> (BS, 2*D) = (16, 64)
    ep = _dot(enc2, we_ref[...]) + be_ref[...]

    scale = 1.0 / math.sqrt(K_DIM)

    def attention(q_src, q_off, k_src, k_off, v_src, v_off, wo, bo_idx):
        # Heads are static 16-lane slices; the score matmul covers all B*S rows
        # at once -- the precomputed bias makes cross-batch entries exp -> 0.
        out = None
        for h in range(NUM_HEADS):
            qh = q_src[:, q_off + h * K_DIM: q_off + (h + 1) * K_DIM]
            kh = k_src[:, k_off + h * K_DIM: k_off + (h + 1) * K_DIM]
            vh = v_src[:, v_off + h * V_DIM: v_off + (h + 1) * V_DIM]
            s = _dot_t(qh, kh) * scale + bias                  # (BS, BS)
            s = s - jnp.max(s, axis=-1, keepdims=True)
            p = jnp.exp(s)
            p = p / jnp.sum(p, axis=-1, keepdims=True)         # exact division
            ctx = _dot(p, vh)                                  # (BS, dv)
            # split-Wo form of "concat(heads) @ Wo": no concat, no head-sum XLU
            oh = _dot(ctx, wo[h * V_DIM:(h + 1) * V_DIM, :])   # (BS, D)
            out = oh if out is None else out + oh
        return out + vrow(bo_idx)

    # ---- self attention + residual + LN1 (dropout = identity in eval) ----
    attn_self = attention(xp, 0, xp, D, xp, 2 * D, wo_ref[0], IDX_BO1)
    y = layer_norm(x2 + attn_self, IDX_G1, IDX_BE1)

    # ---- "encoder" attention (q=enc, k=x, v=enc, exactly as in the module) ----
    attn_cross = attention(ep, 0, xp, 3 * D, ep, D, wo_ref[1], IDX_BO2)
    y = layer_norm(y + attn_cross, IDX_G2, IDX_BE2)

    # ---- position-wise feed-forward: Linear -> ReLU -> Linear, then LN3 ----
    h1 = jnp.maximum(_dot(y, wffn_ref[0]) + vrow(IDX_BF1), 0.0)
    ff = _dot(h1, wffn_ref[1]) + vrow(IDX_BF2)
    out = layer_norm(y + ff, IDX_G3, IDX_BE3)

    out_ref[...] = out.astype(out_ref.dtype)


# ==============================================================================
# Wrapper: pack the 26 PyTorch-style params into 7 arrays (layout plumbing only)
# ==============================================================================
def pack_params(params):
    (wq1, bq1, wk1, bk1, wv1, bv1, wo1, bo1, g1, be1,
     wq2, bq2, wk2, bk2, wv2, bv2, wo2, bo2, g2, be2,
     wf1, bf1, wf2, bf2, g3, be3) = params
    assert NUM_HEADS * K_DIM == MODEL_DIM and NUM_HEADS * V_DIM == MODEL_DIM
    assert INTER_DIM == MODEL_DIM

    wx = jnp.concatenate([wq1, wk1, wv1, wk2], axis=1)       # (D, 4D) = (32, 128)
    bx = jnp.concatenate([bq1, bk1, bv1, bk2], axis=1)       # (1, 4D)
    we = jnp.concatenate([wq2, wv2], axis=1)                 # (D, 2D) = (32, 64)
    be = jnp.concatenate([bq2, bv2], axis=1)                 # (1, 2D)
    wo = jnp.stack([wo1, wo2], axis=0)                       # (2, D, D)
    wffn = jnp.stack([wf1, wf2], axis=0)                     # (2, D, D)
    vecs = jnp.concatenate([bo1, bo2, g1, be1, g2, be2,
                            bf1, bf2, g3, be3], axis=0)      # (10, D)
    return wx, bx, we, be, wo, wffn, vecs


def _mask_bias(trg_mask, B, S):
    # (B,1,S,S) 0/1 -> (B*S, B*S) additive bias: causal within each batch,
    # NEG across batches (lets the per-head score matmul stay one 2D op).
    m = trg_mask.reshape(B, S, S)
    blk = jnp.where(m == 0, NEG, 0.0).astype(jnp.float32)       # (B, S, S)
    eye = jnp.eye(B, dtype=jnp.float32)
    bias4 = jnp.where(eye[:, None, :, None] > 0,
                      blk[:, :, None, :], NEG)                  # (B, S, B, S)
    return bias4.reshape(B * S, B * S)


@jax.jit
def decoder_layer(decoder_input, encoder_output, src_mask, trg_mask, params):
    # src_mask is accepted for signature fidelity but (as in the PyTorch
    # module's forward) never used.
    del src_mask
    B, S, D = decoder_input.shape
    wx, bx, we, be, wo, wffn, vecs = pack_params(params)
    x2 = decoder_input.reshape(B * S, D)          # free in XLA, not in-kernel
    enc2 = encoder_output.reshape(B * S, D)
    bias = _mask_bias(trg_mask, B, S)

    out2 = pl.pallas_call(
        decoder_layer_kernel,
        out_shape=jax.ShapeDtypeStruct((B * S, D), decoder_input.dtype),
    )(x2, enc2, bias, wx, bx, we, be, wo, wffn, vecs)
    return out2.reshape(B, S, D)


# ==============================================================================
# Pure-JAX reference (faithful to the PyTorch module; per-head loop, exact div)
# ==============================================================================
def _layer_norm_ref(x, gamma, beta):
    mean = jnp.mean(x, axis=-1, keepdims=True)
    var = jnp.mean((x - mean) ** 2, axis=-1, keepdims=True)
    return (x - mean) * jax.lax.rsqrt(var + EPS) * gamma + beta


def _mha_ref(q_in, k_in, v_in, mask, wq, bq, wk, bk, wv, bv, wo, bo):
    Q = jnp.dot(q_in, wq) + bq
    K = jnp.dot(k_in, wk) + bk
    V = jnp.dot(v_in, wv) + bv
    scale = 1.0 / math.sqrt(K_DIM)
    heads = []
    for h in range(NUM_HEADS):
        Qh = Q[:, h * K_DIM:(h + 1) * K_DIM]
        Kh = K[:, h * K_DIM:(h + 1) * K_DIM]
        Vh = V[:, h * V_DIM:(h + 1) * V_DIM]
        s = jnp.dot(Qh, Kh.T) * scale
        s = jnp.where(mask == 0, -1e10, s)       # masked_fill(mask==0, -1e10)
        p = jax.nn.softmax(s, axis=-1)
        heads.append(jnp.dot(p, Vh))
    return jnp.dot(jnp.concatenate(heads, axis=-1), wo) + bo


def decoder_layer_ref(x, enc, trg_mask, params):
    (wq1, bq1, wk1, bk1, wv1, bv1, wo1, bo1, g1, be1,
     wq2, bq2, wk2, bk2, wv2, bv2, wo2, bo2, g2, be2,
     wf1, bf1, wf2, bf2, g3, be3) = params

    def one(xb, eb, mb):
        m = mb[0]
        sa = _mha_ref(xb, xb, xb, m, wq1, bq1, wk1, bk1, wv1, bv1, wo1, bo1)
        y = _layer_norm_ref(xb + sa, g1, be1)
        ca = _mha_ref(eb, xb, eb, m, wq2, bq2, wk2, bk2, wv2, bv2, wo2, bo2)
        y = _layer_norm_ref(y + ca, g2, be2)
        h = jnp.maximum(jnp.dot(y, wf1) + bf1, 0.0)
        ff = jnp.dot(h, wf2) + bf2
        return _layer_norm_ref(y + ff, g3, be3)

    return jax.vmap(one)(x, enc, trg_mask)


# ==============================================================================
# Deterministic parameter construction (PyTorch-module-shaped params)
# ==============================================================================
def make_params(key):
    ks = jax.random.split(key, 16)
    D, I, H, dk, dv = MODEL_DIM, INTER_DIM, NUM_HEADS, K_DIM, V_DIM

    def w(k, shape, scale=0.1):
        return (scale * jax.random.normal(k, shape)).astype(jnp.float32)

    return [
        # self attention: Wq, bq, Wk, bk, Wv, bv, Wo, bo
        w(ks[0], (D, H * dk)), jnp.zeros((1, H * dk), jnp.float32),
        w(ks[1], (D, H * dk)), jnp.zeros((1, H * dk), jnp.float32),
        w(ks[2], (D, H * dv)), jnp.zeros((1, H * dv), jnp.float32),
        w(ks[3], (H * dv, D)), jnp.zeros((1, D), jnp.float32),
        # self_attention_layer_norm
        jnp.ones((1, D), jnp.float32), jnp.zeros((1, D), jnp.float32),
        # encoder attention
        w(ks[4], (D, H * dk)), jnp.zeros((1, H * dk), jnp.float32),
        w(ks[5], (D, H * dk)), jnp.zeros((1, H * dk), jnp.float32),
        w(ks[6], (D, H * dv)), jnp.zeros((1, H * dv), jnp.float32),
        w(ks[7], (H * dv, D)), jnp.zeros((1, D), jnp.float32),
        # encoder_attention_layer_norm
        jnp.ones((1, D), jnp.float32), jnp.zeros((1, D), jnp.float32),
        # position-wise feed forward
        w(ks[8], (D, I)), jnp.zeros((1, I), jnp.float32),
        w(ks[9], (I, D)), jnp.zeros((1, D), jnp.float32),
        # ff_layer_norm (LayerNorm(intermediate_dim); INTER_DIM == MODEL_DIM)
        jnp.ones((1, I), jnp.float32), jnp.zeros((1, I), jnp.float32),
    ]


if __name__ == "__main__":
    key = jax.random.PRNGKey(0)
    k_x, k_enc, k_p = jax.random.split(key, 3)

    decoder_input = jax.random.normal(k_x, (BATCH, SEQ, MODEL_DIM), jnp.float32)
    encoder_output = jax.random.normal(k_enc, (BATCH, SEQ, MODEL_DIM), jnp.float32)

    # trg_mask: causal [B, 1, S, S]; src_mask: all-ones (unused by the module).
    causal = jnp.tril(jnp.ones((SEQ, SEQ), jnp.float32))
    trg_mask = jnp.broadcast_to(causal, (BATCH, 1, SEQ, SEQ))
    src_mask = jnp.ones((BATCH, 1, 1, SEQ), jnp.float32)

    params = make_params(k_p)

    out = decoder_layer(decoder_input, encoder_output, src_mask, trg_mask, params)
    out = jax.block_until_ready(out)

    ref = decoder_layer_ref(decoder_input, encoder_output, trg_mask, params)
    assert out.shape == (BATCH, SEQ, MODEL_DIM)
    assert bool(jnp.all(jnp.isfinite(out)))
    # Exact softmax division now -> tight tolerance (only f32 accumulation-order
    # differences between the fused-lane matmuls and the per-head reference).
    assert bool(jnp.allclose(out, ref, atol=1e-4, rtol=1e-4)), \
        float(jnp.max(jnp.abs(out - ref)))

    print("KERNEL_OK")
</pallas_src>

<mosaic_0001>
module attributes {stable_mosaic.version = 11 : i64} {
  func.func @decoder_layer_kernel(%arg0: memref<16x32xf32, #tpu.memory_space<vmem>>, %arg1: memref<16x32xf32, #tpu.memory_space<vmem>>, %arg2: memref<16x16xf32, #tpu.memory_space<vmem>>, %arg3: memref<32x128xf32, #tpu.memory_space<vmem>>, %arg4: memref<1x128xf32, #tpu.memory_space<vmem>>, %arg5: memref<32x64xf32, #tpu.memory_space<vmem>>, %arg6: memref<1x64xf32, #tpu.memory_space<vmem>>, %arg7: memref<2x32x32xf32, #tpu.memory_space<vmem>>, %arg8: memref<2x32x32xf32, #tpu.memory_space<vmem>>, %arg9: memref<10x32xf32, #tpu.memory_space<vmem>>, %arg10: memref<16x32xf32, #tpu.memory_space<vmem>>) attributes {dimension_semantics = [], scalar_prefetch = 0 : i64, scratch_operands = 0 : i64, tpu.core_type = #tpu.core_type<tc>} {
    %c0 = arith.constant 0 : index
    %c0_0 = arith.constant 0 : index
    %0 = vector.load %arg0[%c0, %c0_0] : memref<16x32xf32, #tpu.memory_space<vmem>>, vector<16x32xf32>
    %c0_1 = arith.constant 0 : index
    %c0_2 = arith.constant 0 : index
    %1 = vector.load %arg1[%c0_1, %c0_2] : memref<16x32xf32, #tpu.memory_space<vmem>>, vector<16x32xf32>
    %c0_3 = arith.constant 0 : index
    %c0_4 = arith.constant 0 : index
    %2 = vector.load %arg2[%c0_3, %c0_4] : memref<16x16xf32, #tpu.memory_space<vmem>>, vector<16x16xf32>
    %c0_5 = arith.constant 0 : index
    %c0_6 = arith.constant 0 : index
    %3 = vector.load %arg9[%c0_5, %c0_6] : memref<10x32xf32, #tpu.memory_space<vmem>>, vector<10x32xf32>
    %c0_7 = arith.constant 0 : index
    %c0_8 = arith.constant 0 : index
    %4 = vector.load %arg3[%c0_7, %c0_8] : memref<32x128xf32, #tpu.memory_space<vmem>>, vector<32x128xf32>
    %cst = arith.constant dense<0.000000e+00> : vector<16x128xf32>
    %5 = tpu.matmul %0, %4, %cst {dimension_numbers = #tpu.dot_dimension_numbers<[1], [0], [0], [1], [0, 0, 1, 1], [], []>} : vector<16x32xf32>, vector<32x128xf32>, vector<16x128xf32> -> vector<16x128xf32>
    %c0_9 = arith.constant 0 : index
    %c0_10 = arith.constant 0 : index
    %6 = vector.load %arg4[%c0_9, %c0_10] : memref<1x128xf32, #tpu.memory_space<vmem>>, vector<1x128xf32>
    %7 = vector.broadcast %6 : vector<1x128xf32> to vector<16x128xf32>
    %8 = arith.addf %5, %7 : vector<16x128xf32>
    %c0_11 = arith.constant 0 : index
    %c0_12 = arith.constant 0 : index
    %9 = vector.load %arg5[%c0_11, %c0_12] : memref<32x64xf32, #tpu.memory_space<vmem>>, vector<32x64xf32>
    %cst_13 = arith.constant dense<0.000000e+00> : vector<16x64xf32>
    %10 = tpu.matmul %1, %9, %cst_13 {dimension_numbers = #tpu.dot_dimension_numbers<[1], [0], [0], [1], [0, 0, 1, 1], [], []>} : vector<16x32xf32>, vector<32x64xf32>, vector<16x64xf32> -> vector<16x64xf32>
    %c0_14 = arith.constant 0 : index
    %c0_15 = arith.constant 0 : index
    %11 = vector.load %arg6[%c0_14, %c0_15] : memref<1x64xf32, #tpu.memory_space<vmem>>, vector<1x64xf32>
    %12 = vector.broadcast %11 : vector<1x64xf32> to vector<16x64xf32>
    %13 = arith.addf %10, %12 : vector<16x64xf32>
    %c0_16 = arith.constant 0 : index
    %c0_17 = arith.constant 0 : index
    %c0_18 = arith.constant 0 : index
    %14 = vector.load %arg7[%c0_16, %c0_17, %c0_18] : memref<2x32x32xf32, #tpu.memory_space<vmem>>, vector<1x32x32xf32>
    %15 = vector.shape_cast %14 : vector<1x32x32xf32> to vector<32x32xf32>
    %16 = vector.extract_strided_slice %8 {offsets = [0, 0], sizes = [16, 16], strides = [1, 1]} : vector<16x128xf32> to vector<16x16xf32>
    %17 = vector.extract_strided_slice %8 {offsets = [0, 32], sizes = [16, 16], strides = [1, 1]} : vector<16x128xf32> to vector<16x16xf32>
    %18 = vector.extract_strided_slice %8 {offsets = [0, 64], sizes = [16, 16], strides = [1, 1]} : vector<16x128xf32> to vector<16x16xf32>
    %cst_19 = arith.constant dense<0.000000e+00> : vector<16x16xf32>
    %19 = tpu.matmul %16, %17, %cst_19 {dimension_numbers = #tpu.dot_dimension_numbers<[1], [1], [0], [0], [0, 0, 1, 0], [], []>} : vector<16x16xf32>, vector<16x16xf32>, vector<16x16xf32> -> vector<16x16xf32>
    %cst_20 = arith.constant 2.500000e-01 : f32
    %20 = vector.broadcast %cst_20 : f32 to vector<16x16xf32>
    %21 = arith.mulf %19, %20 : vector<16x16xf32>
    %22 = arith.addf %21, %2 : vector<16x16xf32>
    %cst_21 = arith.constant dense<0xFF800000> : vector<16xf32>
    %23 = vector.multi_reduction <maximumf>, %22, %cst_21 [1] : vector<16x16xf32> to vector<16xf32>
    %24 = vector.shape_cast %23 : vector<16xf32> to vector<16x1xf32>
    %25 = vector.broadcast %24 : vector<16x1xf32> to vector<16x16xf32>
    %26 = arith.subf %22, %25 : vector<16x16xf32>
    %27 = math.exp %26 : vector<16x16xf32>
    %cst_22 = arith.constant dense<0.000000e+00> : vector<16xf32>
    %28 = vector.multi_reduction <add>, %27, %cst_22 [1] : vector<16x16xf32> to vector<16xf32>
    %29 = vector.shape_cast %28 : vector<16xf32> to vector<16x1xf32>
    %30 = vector.broadcast %29 : vector<16x1xf32> to vector<16x16xf32>
    %31 = arith.divf %27, %30 : vector<16x16xf32>
    %cst_23 = arith.constant dense<0.000000e+00> : vector<16x16xf32>
    %32 = tpu.matmul %31, %18, %cst_23 {dimension_numbers = #tpu.dot_dimension_numbers<[1], [0], [0], [1], [0, 0, 1, 1], [], []>} : vector<16x16xf32>, vector<16x16xf32>, vector<16x16xf32> -> vector<16x16xf32>
    %33 = vector.extract_strided_slice %15 {offsets = [0, 0], sizes = [16, 32], strides = [1, 1]} : vector<32x32xf32> to vector<16x32xf32>
    %cst_24 = arith.constant dense<0.000000e+00> : vector<16x32xf32>
    %34 = tpu.matmul %32, %33, %cst_24 {dimension_numbers = #tpu.dot_dimension_numbers<[1], [0], [0], [1], [0, 0, 1, 1], [], []>} : vector<16x16xf32>, vector<16x32xf32>, vector<16x32xf32> -> vector<16x32xf32>
    %35 = vector.extract_strided_slice %8 {offsets = [0, 16], sizes = [16, 16], strides = [1, 1]} : vector<16x128xf32> to vector<16x16xf32>
    %36 = vector.extract_strided_slice %8 {offsets = [0, 48], sizes = [16, 16], strides = [1, 1]} : vector<16x128xf32> to vector<16x16xf32>
    %37 = vector.extract_strided_slice %8 {offsets = [0, 80], sizes = [16, 16], strides = [1, 1]} : vector<16x128xf32> to vector<16x16xf32>
    %cst_25 = arith.constant dense<0.000000e+00> : vector<16x16xf32>
    %38 = tpu.matmul %35, %36, %cst_25 {dimension_numbers = #tpu.dot_dimension_numbers<[1], [1], [0], [0], [0, 0, 1, 0], [], []>} : vector<16x16xf32>, vector<16x16xf32>, vector<16x16xf32> -> vector<16x16xf32>
    %cst_26 = arith.constant 2.500000e-01 : f32
    %39 = vector.broadcast %cst_26 : f32 to vector<16x16xf32>
    %40 = arith.mulf %38, %39 : vector<16x16xf32>
    %41 = arith.addf %40, %2 : vector<16x16xf32>
    %cst_27 = arith.constant dense<0xFF800000> : vector<16xf32>
    %42 = vector.multi_reduction <maximumf>, %41, %cst_27 [1] : vector<16x16xf32> to vector<16xf32>
    %43 = vector.shape_cast %42 : vector<16xf32> to vector<16x1xf32>
    %44 = vector.broadcast %43 : vector<16x1xf32> to vector<16x16xf32>
    %45 = arith.subf %41, %44 : vector<16x16xf32>
    %46 = math.exp %45 : vector<16x16xf32>
    %cst_28 = arith.constant dense<0.000000e+00> : vector<16xf32>
    %47 = vector.multi_reduction <add>, %46, %cst_28 [1] : vector<16x16xf32> to vector<16xf32>
    %48 = vector.shape_cast %47 : vector<16xf32> to vector<16x1xf32>
    %49 = vector.broadcast %48 : vector<16x1xf32> to vector<16x16xf32>
    %50 = arith.divf %46, %49 : vector<16x16xf32>
    %cst_29 = arith.constant dense<0.000000e+00> : vector<16x16xf32>
    %51 = tpu.matmul %50, %37, %cst_29 {dimension_numbers = #tpu.dot_dimension_numbers<[1], [0], [0], [1], [0, 0, 1, 1], [], []>} : vector<16x16xf32>, vector<16x16xf32>, vector<16x16xf32> -> vector<16x16xf32>
    %52 = vector.extract_strided_slice %15 {offsets = [16, 0], sizes = [16, 32], strides = [1, 1]} : vector<32x32xf32> to vector<16x32xf32>
    %cst_30 = arith.constant dense<0.000000e+00> : vector<16x32xf32>
    %53 = tpu.matmul %51, %52, %cst_30 {dimension_numbers = #tpu.dot_dimension_numbers<[1], [0], [0], [1], [0, 0, 1, 1], [], []>} : vector<16x16xf32>, vector<16x32xf32>, vector<16x32xf32> -> vector<16x32xf32>
    %54 = arith.addf %34, %53 : vector<16x32xf32>
    %55 = vector.extract_strided_slice %3 {offsets = [0, 0], sizes = [1, 32], strides = [1, 1]} : vector<10x32xf32> to vector<1x32xf32>
    %56 = vector.broadcast %55 : vector<1x32xf32> to vector<16x32xf32>
    %57 = arith.addf %54, %56 : vector<16x32xf32>
    %58 = arith.addf %0, %57 : vector<16x32xf32>
    %cst_31 = arith.constant dense<0.000000e+00> : vector<16xf32>
    %59 = vector.multi_reduction <add>, %58, %cst_31 [1] : vector<16x32xf32> to vector<16xf32>
    %60 = vector.shape_cast %59 : vector<16xf32> to vector<16x1xf32>
    %cst_32 = arith.constant 3.200000e+01 : f32
    %61 = vector.broadcast %cst_32 : f32 to vector<16x1xf32>
    %62 = arith.divf %60, %61 : vector<16x1xf32>
    %63 = vector.broadcast %62 : vector<16x1xf32> to vector<16x32xf32>
    %64 = arith.subf %58, %63 : vector<16x32xf32>
    %65 = arith.mulf %64, %64 : vector<16x32xf32>
    %cst_33 = arith.constant dense<0.000000e+00> : vector<16xf32>
    %66 = vector.multi_reduction <add>, %65, %cst_33 [1] : vector<16x32xf32> to vector<16xf32>
    %67 = vector.shape_cast %66 : vector<16xf32> to vector<16x1xf32>
    %cst_34 = arith.constant 3.200000e+01 : f32
    %68 = vector.broadcast %cst_34 : f32 to vector<16x1xf32>
    %69 = arith.divf %67, %68 : vector<16x1xf32>
    %70 = vector.broadcast %62 : vector<16x1xf32> to vector<16x32xf32>
    %71 = arith.subf %58, %70 : vector<16x32xf32>
    %cst_35 = arith.constant 9.99999974E-6 : f32
    %72 = vector.broadcast %cst_35 : f32 to vector<16x1xf32>
    %73 = arith.addf %69, %72 : vector<16x1xf32>
    %74 = math.rsqrt %73 : vector<16x1xf32>
    %75 = vector.broadcast %74 : vector<16x1xf32> to vector<16x32xf32>
    %76 = arith.mulf %71, %75 : vector<16x32xf32>
    %77 = vector.extract_strided_slice %3 {offsets = [2, 0], sizes = [1, 32], strides = [1, 1]} : vector<10x32xf32> to vector<1x32xf32>
    %78 = vector.broadcast %77 : vector<1x32xf32> to vector<16x32xf32>
    %79 = arith.mulf %76, %78 : vector<16x32xf32>
    %80 = vector.extract_strided_slice %3 {offsets = [3, 0], sizes = [1, 32], strides = [1, 1]} : vector<10x32xf32> to vector<1x32xf32>
    %81 = vector.broadcast %80 : vector<1x32xf32> to vector<16x32xf32>
    %82 = arith.addf %79, %81 : vector<16x32xf32>
    %c1 = arith.constant 1 : index
    %c0_36 = arith.constant 0 : index
    %c0_37 = arith.constant 0 : index
    %83 = vector.load %arg7[%c1, %c0_36, %c0_37] : memref<2x32x32xf32, #tpu.memory_space<vmem>>, vector<1x32x32xf32>
    %84 = vector.shape_cast %83 : vector<1x32x32xf32> to vector<32x32xf32>
    %85 = vector.extract_strided_slice %13 {offsets = [0, 0], sizes = [16, 16], strides = [1, 1]} : vector<16x64xf32> to vector<16x16xf32>
    %86 = vector.extract_strided_slice %8 {offsets = [0, 96], sizes = [16, 16], strides = [1, 1]} : vector<16x128xf32> to vector<16x16xf32>
    %87 = vector.extract_strided_slice %13 {offsets = [0, 32], sizes = [16, 16], strides = [1, 1]} : vector<16x64xf32> to vector<16x16xf32>
    %cst_38 = arith.constant dense<0.000000e+00> : vector<16x16xf32>
    %88 = tpu.matmul %85, %86, %cst_38 {dimension_numbers = #tpu.dot_dimension_numbers<[1], [1], [0], [0], [0, 0, 1, 0], [], []>} : vector<16x16xf32>, vector<16x16xf32>, vector<16x16xf32> -> vector<16x16xf32>
    %cst_39 = arith.constant 2.500000e-01 : f32
    %89 = vector.broadcast %cst_39 : f32 to vector<16x16xf32>
    %90 = arith.mulf %88, %89 : vector<16x16xf32>
    %91 = arith.addf %90, %2 : vector<16x16xf32>
    %cst_40 = arith.constant dense<0xFF800000> : vector<16xf32>
    %92 = vector.multi_reduction <maximumf>, %91, %cst_40 [1] : vector<16x16xf32> to vector<16xf32>
    %93 = vector.shape_cast %92 : vector<16xf32> to vector<16x1xf32>
    %94 = vector.broadcast %93 : vector<16x1xf32> to vector<16x16xf32>
    %95 = arith.subf %91, %94 : vector<16x16xf32>
    %96 = math.exp %95 : vector<16x16xf32>
    %cst_41 = arith.constant dense<0.000000e+00> : vector<16xf32>
    %97 = vector.multi_reduction <add>, %96, %cst_41 [1] : vector<16x16xf32> to vector<16xf32>
    %98 = vector.shape_cast %97 : vector<16xf32> to vector<16x1xf32>
    %99 = vector.broadcast %98 : vector<16x1xf32> to vector<16x16xf32>
    %100 = arith.divf %96, %99 : vector<16x16xf32>
    %cst_42 = arith.constant dense<0.000000e+00> : vector<16x16xf32>
    %101 = tpu.matmul %100, %87, %cst_42 {dimension_numbers = #tpu.dot_dimension_numbers<[1], [0], [0], [1], [0, 0, 1, 1], [], []>} : vector<16x16xf32>, vector<16x16xf32>, vector<16x16xf32> -> vector<16x16xf32>
    %102 = vector.extract_strided_slice %84 {offsets = [0, 0], sizes = [16, 32], strides = [1, 1]} : vector<32x32xf32> to vector<16x32xf32>
    %cst_43 = arith.constant dense<0.000000e+00> : vector<16x32xf32>
    %103 = tpu.matmul %101, %102, %cst_43 {dimension_numbers = #tpu.dot_dimension_numbers<[1], [0], [0], [1], [0, 0, 1, 1], [], []>} : vector<16x16xf32>, vector<16x32xf32>, vector<16x32xf32> -> vector<16x32xf32>
    %104 = vector.extract_strided_slice %13 {offsets = [0, 16], sizes = [16, 16], strides = [1, 1]} : vector<16x64xf32> to vector<16x16xf32>
    %105 = vector.extract_strided_slice %8 {offsets = [0, 112], sizes = [16, 16], strides = [1, 1]} : vector<16x128xf32> to vector<16x16xf32>
    %106 = vector.extract_strided_slice %13 {offsets = [0, 48], sizes = [16, 16], strides = [1, 1]} : vector<16x64xf32> to vector<16x16xf32>
    %cst_44 = arith.constant dense<0.000000e+00> : vector<16x16xf32>
    %107 = tpu.matmul %104, %105, %cst_44 {dimension_numbers = #tpu.dot_dimension_numbers<[1], [1], [0], [0], [0, 0, 1, 0], [], []>} : vector<16x16xf32>, vector<16x16xf32>, vector<16x16xf32> -> vector<16x16xf32>
    %cst_45 = arith.constant 2.500000e-01 : f32
    %108 = vector.broadcast %cst_45 : f32 to vector<16x16xf32>
    %109 = arith.mulf %107, %108 : vector<16x16xf32>
    %110 = arith.addf %109, %2 : vector<16x16xf32>
    %cst_46 = arith.constant dense<0xFF800000> : vector<16xf32>
    %111 = vector.multi_reduction <maximumf>, %110, %cst_46 [1] : vector<16x16xf32> to vector<16xf32>
    %112 = vector.shape_cast %111 : vector<16xf32> to vector<16x1xf32>
    %113 = vector.broadcast %112 : vector<16x1xf32> to vector<16x16xf32>
    %114 = arith.subf %110, %113 : vector<16x16xf32>
    %115 = math.exp %114 : vector<16x16xf32>
    %cst_47 = arith.constant dense<0.000000e+00> : vector<16xf32>
    %116 = vector.multi_reduction <add>, %115, %cst_47 [1] : vector<16x16xf32> to vector<16xf32>
    %117 = vector.shape_cast %116 : vector<16xf32> to vector<16x1xf32>
    %118 = vector.broadcast %117 : vector<16x1xf32> to vector<16x16xf32>
    %119 = arith.divf %115, %118 : vector<16x16xf32>
    %cst_48 = arith.constant dense<0.000000e+00> : vector<16x16xf32>
    %120 = tpu.matmul %119, %106, %cst_48 {dimension_numbers = #tpu.dot_dimension_numbers<[1], [0], [0], [1], [0, 0, 1, 1], [], []>} : vector<16x16xf32>, vector<16x16xf32>, vector<16x16xf32> -> vector<16x16xf32>
    %121 = vector.extract_strided_slice %84 {offsets = [16, 0], sizes = [16, 32], strides = [1, 1]} : vector<32x32xf32> to vector<16x32xf32>
    %cst_49 = arith.constant dense<0.000000e+00> : vector<16x32xf32>
    %122 = tpu.matmul %120, %121, %cst_49 {dimension_numbers = #tpu.dot_dimension_numbers<[1], [0], [0], [1], [0, 0, 1, 1], [], []>} : vector<16x16xf32>, vector<16x32xf32>, vector<16x32xf32> -> vector<16x32xf32>
    %123 = arith.addf %103, %122 : vector<16x32xf32>
    %124 = vector.extract_strided_slice %3 {offsets = [1, 0], sizes = [1, 32], strides = [1, 1]} : vector<10x32xf32> to vector<1x32xf32>
    %125 = vector.broadcast %124 : vector<1x32xf32> to vector<16x32xf32>
    %126 = arith.addf %123, %125 : vector<16x32xf32>
    %127 = arith.addf %82, %126 : vector<16x32xf32>
    %cst_50 = arith.constant dense<0.000000e+00> : vector<16xf32>
    %128 = vector.multi_reduction <add>, %127, %cst_50 [1] : vector<16x32xf32> to vector<16xf32>
    %129 = vector.shape_cast %128 : vector<16xf32> to vector<16x1xf32>
    %cst_51 = arith.constant 3.200000e+01 : f32
    %130 = vector.broadcast %cst_51 : f32 to vector<16x1xf32>
    %131 = arith.divf %129, %130 : vector<16x1xf32>
    %132 = vector.broadcast %131 : vector<16x1xf32> to vector<16x32xf32>
    %133 = arith.subf %127, %132 : vector<16x32xf32>
    %134 = arith.mulf %133, %133 : vector<16x32xf32>
    %cst_52 = arith.constant dense<0.000000e+00> : vector<16xf32>
    %135 = vector.multi_reduction <add>, %134, %cst_52 [1] : vector<16x32xf32> to vector<16xf32>
    %136 = vector.shape_cast %135 : vector<16xf32> to vector<16x1xf32>
    %cst_53 = arith.constant 3.200000e+01 : f32
    %137 = vector.broadcast %cst_53 : f32 to vector<16x1xf32>
    %138 = arith.divf %136, %137 : vector<16x1xf32>
    %139 = vector.broadcast %131 : vector<16x1xf32> to vector<16x32xf32>
    %140 = arith.subf %127, %139 : vector<16x32xf32>
    %cst_54 = arith.constant 9.99999974E-6 : f32
    %141 = vector.broadcast %cst_54 : f32 to vector<16x1xf32>
    %142 = arith.addf %138, %141 : vector<16x1xf32>
    %143 = math.rsqrt %142 : vector<16x1xf32>
    %144 = vector.broadcast %143 : vector<16x1xf32> to vector<16x32xf32>
    %145 = arith.mulf %140, %144 : vector<16x32xf32>
    %146 = vector.extract_strided_slice %3 {offsets = [4, 0], sizes = [1, 32], strides = [1, 1]} : vector<10x32xf32> to vector<1x32xf32>
    %147 = vector.broadcast %146 : vector<1x32xf32> to vector<16x32xf32>
    %148 = arith.mulf %145, %147 : vector<16x32xf32>
    %149 = vector.extract_strided_slice %3 {offsets = [5, 0], sizes = [1, 32], strides = [1, 1]} : vector<10x32xf32> to vector<1x32xf32>
    %150 = vector.broadcast %149 : vector<1x32xf32> to vector<16x32xf32>
    %151 = arith.addf %148, %150 : vector<16x32xf32>
    %c0_55 = arith.constant 0 : index
    %c0_56 = arith.constant 0 : index
    %c0_57 = arith.constant 0 : index
    %152 = vector.load %arg8[%c0_55, %c0_56, %c0_57] : memref<2x32x32xf32, #tpu.memory_space<vmem>>, vector<1x32x32xf32>
    %153 = vector.shape_cast %152 : vector<1x32x32xf32> to vector<32x32xf32>
    %cst_58 = arith.constant dense<0.000000e+00> : vector<16x32xf32>
    %154 = tpu.matmul %151, %153, %cst_58 {dimension_numbers = #tpu.dot_dimension_numbers<[1], [0], [0], [1], [0, 0, 1, 1], [], []>} : vector<16x32xf32>, vector<32x32xf32>, vector<16x32xf32> -> vector<16x32xf32>
    %155 = vector.extract_strided_slice %3 {offsets = [6, 0], sizes = [1, 32], strides = [1, 1]} : vector<10x32xf32> to vector<1x32xf32>
    %156 = vector.broadcast %155 : vector<1x32xf32> to vector<16x32xf32>
    %157 = arith.addf %154, %156 : vector<16x32xf32>
    %cst_59 = arith.constant 0.000000e+00 : f32
    %158 = vector.broadcast %cst_59 : f32 to vector<16x32xf32>
    %159 = arith.maximumf %157, %158 : vector<16x32xf32>
    %c1_60 = arith.constant 1 : index
    %c0_61 = arith.constant 0 : index
    %c0_62 = arith.constant 0 : index
    %160 = vector.load %arg8[%c1_60, %c0_61, %c0_62] : memref<2x32x32xf32, #tpu.memory_space<vmem>>, vector<1x32x32xf32>
    %161 = vector.shape_cast %160 : vector<1x32x32xf32> to vector<32x32xf32>
    %cst_63 = arith.constant dense<0.000000e+00> : vector<16x32xf32>
    %162 = tpu.matmul %159, %161, %cst_63 {dimension_numbers = #tpu.dot_dimension_numbers<[1], [0], [0], [1], [0, 0, 1, 1], [], []>} : vector<16x32xf32>, vector<32x32xf32>, vector<16x32xf32> -> vector<16x32xf32>
    %163 = vector.extract_strided_slice %3 {offsets = [7, 0], sizes = [1, 32], strides = [1, 1]} : vector<10x32xf32> to vector<1x32xf32>
    %164 = vector.broadcast %163 : vector<1x32xf32> to vector<16x32xf32>
    %165 = arith.addf %162, %164 : vector<16x32xf32>
    %166 = arith.addf %151, %165 : vector<16x32xf32>
    %cst_64 = arith.constant dense<0.000000e+00> : vector<16xf32>
    %167 = vector.multi_reduction <add>, %166, %cst_64 [1] : vector<16x32xf32> to vector<16xf32>
    %168 = vector.shape_cast %167 : vector<16xf32> to vector<16x1xf32>
    %cst_65 = arith.constant 3.200000e+01 : f32
    %169 = vector.broadcast %cst_65 : f32 to vector<16x1xf32>
    %170 = arith.divf %168, %169 : vector<16x1xf32>
    %171 = vector.broadcast %170 : vector<16x1xf32> to vector<16x32xf32>
    %172 = arith.subf %166, %171 : vector<16x32xf32>
    %173 = arith.mulf %172, %172 : vector<16x32xf32>
    %cst_66 = arith.constant dense<0.000000e+00> : vector<16xf32>
    %174 = vector.multi_reduction <add>, %173, %cst_66 [1] : vector<16x32xf32> to vector<16xf32>
    %175 = vector.shape_cast %174 : vector<16xf32> to vector<16x1xf32>
    %cst_67 = arith.constant 3.200000e+01 : f32
    %176 = vector.broadcast %cst_67 : f32 to vector<16x1xf32>
    %177 = arith.divf %175, %176 : vector<16x1xf32>
    %178 = vector.broadcast %170 : vector<16x1xf32> to vector<16x32xf32>
    %179 = arith.subf %166, %178 : vector<16x32xf32>
    %cst_68 = arith.constant 9.99999974E-6 : f32
    %180 = vector.broadcast %cst_68 : f32 to vector<16x1xf32>
    %181 = arith.addf %177, %180 : vector<16x1xf32>
    %182 = math.rsqrt %181 : vector<16x1xf32>
    %183 = vector.broadcast %182 : vector<16x1xf32> to vector<16x32xf32>
    %184 = arith.mulf %179, %183 : vector<16x32xf32>
    %185 = vector.extract_strided_slice %3 {offsets = [8, 0], sizes = [1, 32], strides = [1, 1]} : vector<10x32xf32> to vector<1x32xf32>
    %186 = vector.broadcast %185 : vector<1x32xf32> to vector<16x32xf32>
    %187 = arith.mulf %184, %186 : vector<16x32xf32>
    %188 = vector.extract_strided_slice %3 {offsets = [9, 0], sizes = [1, 32], strides = [1, 1]} : vector<10x32xf32> to vector<1x32xf32>
    %189 = vector.broadcast %188 : vector<1x32xf32> to vector<16x32xf32>
    %190 = arith.addf %187, %189 : vector<16x32xf32>
    %c0_69 = arith.constant 0 : index
    %c0_70 = arith.constant 0 : index
    %191 = vector.load %arg10[%c0_69, %c0_70] : memref<16x32xf32, #tpu.memory_space<vmem>>, vector<16x32xf32>
    tpu.vector_store %arg10[%c0_69, %c0_70], %190 {strides = array<i32>} : memref<16x32xf32, #tpu.memory_space<vmem>>, vector<16x32xf32>,
    return
  }
}

</mosaic_0001>

<bundles_post_ra>
// kernel: decoder_layer.1
= control target key start
LH: loop header
LB: loop body
LE: loop exit
PB: predicated region body
PF: predicated region fallthrough
CT: control target
= control target key end

     0   :  { %vm55_vm0 = vcmask 261120   ;;  %s2386_s0 = inlined_call_operand.vmem [shape: f32[16,32], index: 0, kind: input, shape index: {}]   ;;  %s2387_s1 = inlined_call_operand.vmem [shape: f32[16,32], index: 1, kind: input, shape index: {}]   ;;  %s2388_s2 = inlined_call_operand.vmem [shape: f32[16,16], index: 2, kind: input, shape index: {}]   ;;  %s2389_s3 = inlined_call_operand.vmem [shape: f32[32,128], index: 3, kind: input, shape index: {}]   ;;  %s2390_s4 = inlined_call_operand.vmem [shape: f32[1,128], index: 4, kind: input, shape index: {}]   ;;  %s2391_s5 = inlined_call_operand.vmem [shape: f32[32,64], index: 5, kind: input, shape index: {}]   ;;  %s2392_s6 = inlined_call_operand.vmem [shape: f32[1,64], index: 6, kind: input, shape index: {}]   ;;  %s2393_s7 = inlined_call_operand.vmem [shape: f32[2,32,32], index: 7, kind: input, shape index: {}]   ;;  %s2394_s8 = inlined_call_operand.vmem [shape: f32[2,32,32], index: 8, kind: input, shape index: {}]   ;;  %s2395_s9 = inlined_call_operand.vmem [shape: f32[10,32], index: 9, kind: input, shape index: {}]   ;;  %s2396_s10 = inlined_call_operand.hbm [shape: f32[16,32], index: 10, kind: output, shape index: {}]  }
   0x1   :  { %v47_v0 = vld [vmem:[%s2389_s3 + $0x18] sm:$0xff]  ;;  %v46_v1 = vld [vmem:[%s2389_s3 + $0x10] sm:$0xff]  ;;  %v2107_v2 = vld [vmem:[%s2386_s0] sm:$0xff] }
   0x2   :  { %1829 = vmatprep.subr.mxu0 %v47_v0  ;;  %v45_v3 = vld [vmem:[%s2389_s3 + $0x8] sm:$0xff]  ;;  %1837 = vmatprep.mubr.msk.f32.mxu0 %vm55_vm0, %v2107_v2 }
   0x3   :  { %1830 = vmatpush3.msra.mxu0 %v47_v0 }
   0x4   :  { %15 = vsyncpa [#allocation3], 0  ;;  %1831 = vmatprep.subr.mxu0 %v46_v1  ;;  %v44_v4 = vld [vmem:[%s2389_s3] sm:$0xff]  ;;  %v2120_v5 = vld [vmem:[%s2386_s0 + $0x8] sm:$0xff]  ;;  %vm239_vm1 = vcmask 130048   ;;  %s2033_s3 = smov 96  }
   0x5   :  { %1832 = vmatpush3.msra.mxu0 %v46_v1  ;;  %v1707_v6 = vld [vmem:[%s2390_s4] ss:$0 sm:$0xff]  ;;  %v2151_v18 = vld [vmem:[%s2388_s2 + $0x8] sm:$0xff]  ;;  %v140_v33 = vld [vmem:[%s2391_s5 + $0x18] sm:$0xff]  ;;  %s2034_s20 = smov 64   ;;  %s2035_s21 = smov 112  }
   0x6   :  { %1833 = vmatprep.subr.mxu0 %v45_v3  ;;  %v2146_v15 = vld [vmem:[%s2388_s2] sm:$0xff]  ;;  %1840 = vmatprep.subr.mxu1 %v140_v33  ;;  %v139_v34 = vld [vmem:[%s2391_s5 + $0x10] sm:$0xff]  ;;  %v138_v35 = vld [vmem:[%s2391_s5 + $0x8] sm:$0xff]  ;;  %s2037_s25 = smov 48   ;;  %s2038_s26 = smov 32  }
   0x7   :  { %1834 = vmatpush3.msra.mxu0 %v45_v3  ;;  %1841 = vmatpush3.msra.mxu1 %v140_v33  ;;  %v137_v36 = vld [vmem:[%s2391_s5] sm:$0xff]  ;;  %v39_v38 = vld [vmem:[%s2387_s1 + $0x8] sm:$0xff]  ;;  %s2036_s5 = smov 80   ;;  %s2039_s11 = smov 16  }
   0x8   :  { %1835 = vmatprep.subr.mxu0 %v44_v4  ;;  %1842 = vmatprep.subr.mxu1 %v139_v34  ;;  %v38_v37 = vld [vmem:[%s2387_s1] sm:$0xff]  ;;  %v230_v51 = vld [vmem:[%s2393_s7 + $0x8] sm:$0xff] }
   0x9   :  { %1836 = vmatpush3.msra.mxu0 %v44_v4  ;;  %1843 = vmatpush3.msra.mxu1 %v139_v34  ;;  %v229_v52 = vld [vmem:[%s2393_s7] sm:$0xff]  ;;  %v802_v34 = vlaneseq }
   0xa   :  { %1838 = vmatmul.mubr.msk.f32.vlgmr.msra.gmra.mxu0 %vm55_vm0, %v2120_v5  ;;  %1844 = vmatprep.subr.mxu1 %v138_v35 }
   0xb   :  { %1845 = vmatpush3.msra.mxu1 %v138_v35  ;;  %1848 = vmatprep.mubr.msk.f32.mxu1 %vm55_vm0, %v38_v37  ;;  %v2243_v35 = vshrl.u32 %v802_v34, 7  ;;  %v2249_v37 = vld [vmem:[%s2395_s9] sm:$0xff] }
   0xc   :  { %1846 = vmatprep.subr.mxu1 %v137_v36 }
   0xd   :  { %1847 = vmatpush3.msra.mxu1 %v137_v36  ;;  %v804_v36 = vsub.s32 0, %v2243_v35 }
   0xe   :  { %1849 = vmatmul.mubr.msk.f32.vlgmr.msra.gmra.mxu1 %vm55_vm0, %v39_v38 }
   0xf   :  { %v2254_v38 = vrot.slane %v2249_v37, %v804_v36 }
  0xca   :  { %v1839_v7 = vpop.f32.mrf.mxu0 }
  0xcb   :  { %v2127_v8 = vadd.f32 %v1839_v7, %v1707_v6 }
  0xcc   :  { %v128_v9 = vpop.f32.mrf.mxu0 }
  0xcd   :  { %v2129_v10 = vadd.f32 %v1707_v6, %v128_v9  ;;  %237 = vrot.lane.b32.xlu0 %v2127_v8, %s2033_s3 }
  0xce   :  { %v2203_v53 = vpop.f32.mrf.mxu1 }
  0xcf   :  { %1855 = vmatprep.mubr.msk.f32.mxu0 %vm239_vm1, %v2129_v10 }
  0xd0   :  { %v220_v54 = vpop.f32.mrf.mxu1 }
  0xd1   :  { %235 = vrot.lane.b32.xlu0 %v2129_v10, %s2033_s3 }
 0x13f   :  { %v238_v11 = vpop.permute.xlu0 %237 }
 0x140   :  { %1851 = vmatprep.subr.msk.mxu0 %vm239_vm1, %v238_v11 }
 0x141   :  { %1852 = vmatpush3.xpose.msk.msra.mxu0 %vm239_vm1, %v238_v11 }
 0x143   :  { %v236_v12 = vpop.permute.xlu0 %235 }
 0x144   :  { %1853 = vmatprep.subr.msk.mxu0 %vm239_vm1, %v236_v12 }
 0x145   :  { %1854 = vmatpush3.xpose.msk.msra.mxu0 %vm239_vm1, %v236_v12 }
 0x148   :  { %1856 = vmatmul.mubr.msk.f32.vlgmr.msra.gmra.mxu0 %vm239_vm1, %v2127_v8 }
 0x208   :  { %v1857_v13 = vpop.f32.mrf.mxu0 }
 0x209   :  { %v324_v16 = vmul.f32 0.25, %v1857_v13 }
 0x20a   :  { %v314_v14 = vpop.f32.mrf.mxu0 }
 0x20b   :  { %v323_v17 = vmul.f32 0.25, %v314_v14  ;;  %v326_v21 = vadd.f32 %v324_v16, %v2151_v18 }
 0x20d   :  { %v325_v19 = vadd.f32 %v323_v17, %v2146_v15  ;;  %v330_v22 = vsel %vm239_vm1, %v326_v21, -inf }
 0x20f   :  { %v327_v20 = vsel %vm239_vm1, %v325_v19, -inf }
 0x210   :  { %328 = vmax.xlane.f32.xlu1 %v327_v20 }
 0x214   :  { %331 = vmax.xlane.f32.xlu1 %v330_v22 }
 0x299   :  { %v329_v23 = vpop.xlane.xlu1 %328 }
 0x29a   :  { %v333_v24 = vsub.f32 %v325_v19, %v329_v23 }
 0x29c   :  { %v335_v25 = vmul.f32 1.442695, %v333_v24 }
 0x29d   :  { %v332_v26 = vpop.xlane.xlu1 %331 }
 0x29e   :  { %1967 = vpow2.f32 %v335_v25  ;;  %v334_v27 = vsub.f32 %v326_v21, %v332_v26  ;;  %v232_v21 = vld [vmem:[%s2393_s7 + $0x18] sm:$0xff]  ;;  %v231_v26 = vld [vmem:[%s2393_s7 + $0x10] sm:$0xff] }
 0x2a0   :  { %v337_v28 = vmul.f32 1.442695, %v334_v27 }
 0x2a2   :  { %1969 = vpow2.f32 %v337_v28  ;;  %v1710_v28 = vld [vmem:[%s2392_s6] ss:$0 sm:$0xff]  ;;  %s2040_s6 = smov [#allocation2]  }
 0x2a3   :  { %v2239_v33 = vadd.f32 %v2203_v53, %v1710_v28  ;;  %s1696_s30 = sshll.u32 %s2040_s6, 4  ;;  %s1697_s30 = int_to_ptr.vmem [resolvable:$true] %s1696_s30 }
 0x2a4   :  { %p2016_p1 = scmp.lt.s32.totalorder %s1697_s30, %s1697_s30 }
 0x2ab   :  { %v1968_v29 = vpop.eup %1967 }
 0x2ac   :  { %v339_v30 = vsel %vm239_vm1, %v1968_v29, 0.0 }
 0x2ad   :  { %340 = vadd.xlane.f32.xlu0 %v339_v30 }
 0x2af   :  { %v1970_v31 = vpop.eup %1969 }
 0x2b0   :  { %v342_v32 = vsel %vm239_vm1, %v1970_v31, 0.0 }
 0x2b1   :  { %343 = vadd.xlane.f32.xlu1 %v342_v32 }
 0x2c2   :  { %351 = vrot.lane.b32.xlu1 %v2127_v8, %s2034_s20 }
 0x2c3   :  { %436 = vrot.lane.b32.xlu0 %v2129_v10, %s2035_s21 }
 0x2c6   :  { %349 = vrot.lane.b32.xlu1 %v2129_v10, %s2034_s20 }
 0x2ca   :  { %442 = vrot.lane.b32.xlu1 %v2127_v8, %s2036_s5 }
 0x2ce   :  { %440 = vrot.lane.b32.xlu1 %v2129_v10, %s2036_s5 }
 0x2d2   :  { %438 = vrot.lane.b32.xlu1 %v2127_v8, %s2035_s21 }
 0x336   :  { %v341_v39 = vpop.xlane.xlu0 %340 }
 0x337   :  { %1971 = vrcp.f32 %v341_v39 }
 0x33a   :  { %v344_v40 = vpop.xlane.xlu1 %343  ;;  %v437_v49 = vpop.permute.xlu0 %436 }
 0x33b   :  { %1973 = vrcp.f32 %v344_v40 }
 0x33e   :  { %v352_v41 = vpop.permute.xlu1 %351 }
 0x33f   :  { %1858 = vmatprep.subr.mxu1 %v352_v41 }
 0x340   :  { %1859 = vmatpush3.msra.mxu1 %v352_v41 }
 0x342   :  { %v350_v42 = vpop.permute.xlu1 %349 }
 0x343   :  { %1860 = vmatprep.subr.mxu1 %v350_v42 }
 0x344   :  { %v1972_v43 = vpop.eup %1971  ;;  %1861 = vmatpush3.msra.mxu1 %v350_v42 }
 0x345   :  { %v346_v44 = vmul.f32 %v1972_v43, %v1968_v29 }
 0x346   :  { %v443_v45 = vpop.permute.xlu1 %442 }
 0x347   :  { %1862 = vmatprep.mubr.msk.f32.mxu1 %vm239_vm1, %v346_v44  ;;  %1865 = vmatprep.subr.msk.mxu1 %vm239_vm1, %v443_v45 }
 0x348   :  { %v1974_v46 = vpop.eup %1973 }
 0x349   :  { %v348_v47 = vmul.f32 %v1974_v46, %v1970_v31  ;;  %v2229_v31 = vadd.f32 %v1710_v28, %v220_v54 }
 0x34a   :  { %v441_v48 = vpop.permute.xlu1 %440 }
 0x34b   :  { %1863 = vmatmul.mubr.msk.f32.vlgmr.msra.gmra.mxu1 %vm239_vm1, %v348_v47 }
 0x34c   :  { %1866 = vmatpush3.xpose.msk.msra.mxu1 %vm239_vm1, %v443_v45  ;;  %1869 = vmatprep.mubr.msk.f32.mxu1 %vm239_vm1, %v437_v49 }
 0x34d   :  { %1867 = vmatprep.subr.msk.mxu1 %vm239_vm1, %v441_v48 }
 0x34e   :  { %v439_v50 = vpop.permute.xlu1 %438 }
 0x350   :  { %1868 = vmatpush3.xpose.msk.msra.mxu1 %vm239_vm1, %v441_v48 }
 0x351   :  { %1886 = vmatprep.subr.mxu1 %v230_v51 }
 0x353   :  { %1870 = vmatmul.mubr.msk.f32.vlgmr.msra.gmra.mxu1 %vm239_vm1, %v439_v50 }
 0x354   :  { %1887 = vmatpush3.msra.mxu1 %v230_v51 }
 0x355   :  { %1888 = vmatprep.subr.mxu1 %v229_v52 }
 0x356   :  { %1889 = vmatpush3.msra.mxu1 %v229_v52 }
 0x40b   :  { %v1864_v55 = vpop.f32.mrf.mxu1 }
 0x40d   :  { %v427_v56 = vpop.f32.mrf.mxu1 }
 0x40e   :  { %1890 = vmatprep.mubr.msk.f32.mxu1 %vm239_vm1, %v427_v56 }
 0x40f   :  { %1891 = vmatmul.mubr.msk.f32.vlgmr.msra.gmra.mxu1 %vm239_vm1, %v1864_v55 }
 0x413   :  { %v1871_v57 = vpop.f32.mrf.mxu1 }
 0x414   :  { %v528_v58 = vmul.f32 0.25, %v1871_v57 }
 0x415   :  { %v518_v59 = vpop.f32.mrf.mxu1 }
 0x416   :  { %v527_v60 = vmul.f32 0.25, %v518_v59  ;;  %v530_v61 = vadd.f32 %v528_v58, %v2151_v18 }
 0x418   :  { %v534_v62 = vsel %vm239_vm1, %v530_v61, -inf  ;;  %v529_v63 = vadd.f32 %v527_v60, %v2146_v15 }
 0x419   :  { %535 = vmax.xlane.f32.xlu0 %v534_v62 }
 0x41a   :  { %v531_v0 = vsel %vm239_vm1, %v529_v63, -inf }
 0x41b   :  { %532 = vmax.xlane.f32.xlu1 %v531_v0 }
 0x42f   :  { %553 = vrot.lane.b32.xlu0 %v2129_v10, %s2037_s25 }
 0x4a2   :  { %v536_v1 = vpop.xlane.xlu0 %535 }
 0x4a3   :  { %v538_v3 = vsub.f32 %v530_v61, %v536_v1 }
 0x4a4   :  { %v533_v4 = vpop.xlane.xlu1 %532 }
 0x4a5   :  { %v541_v6 = vmul.f32 1.442695, %v538_v3  ;;  %v537_v7 = vsub.f32 %v529_v63, %v533_v4 }
 0x4a6   :  { %v554_v20 = vpop.permute.xlu0 %553 }
 0x4a7   :  { %1975 = vpow2.f32 %v541_v6  ;;  %v539_v9 = vmul.f32 1.442695, %v537_v7 }
 0x4a9   :  { %1977 = vpow2.f32 %v539_v9 }
 0x4b4   :  { %v1976_v11 = vpop.eup %1975 }
 0x4b5   :  { %v546_v12 = vsel %vm239_vm1, %v1976_v11, 0.0 }
 0x4b6   :  { %v1978_v13 = vpop.eup %1977  ;;  %547 = vadd.xlane.f32.xlu1 %v546_v12  ;;  %v1730_v12 = vld [vmem:[%s2393_s7 + $0x28] sm:$0xff] }
 0x4b7   :  { %v543_v14 = vsel %vm239_vm1, %v1978_v13, 0.0 }
 0x4ba   :  { %544 = vadd.xlane.f32.xlu1 %v543_v14 }
 0x4cb   :  { %555 = vrot.lane.b32.xlu1 %v2127_v8, %s2037_s25 }
 0x4cf   :  { %856 = vrot.lane.b32.xlu1 %v2127_v8, %s2038_s26  ;;  %v1892_v39 = vpop.f32.mrf.mxu1 }
 0x4d1   :  { %v793_v14 = vpop.f32.mrf.mxu1 }
 0x4d3   :  { %854 = vrot.lane.b32.xlu1 %v2129_v10, %s2038_s26 }
 0x53f   :  { %v548_v16 = vpop.xlane.xlu1 %547 }
 0x540   :  { %1979 = vrcp.f32 %v548_v16 }
 0x543   :  { %v545_v17 = vpop.xlane.xlu1 %544 }
 0x544   :  { %1981 = vrcp.f32 %v545_v17 }
 0x547   :  { %v556_v19 = vpop.permute.xlu1 %555 }
 0x548   :  { %1872 = vmatprep.subr.mxu0 %v556_v19 }
 0x549   :  { %1873 = vmatpush3.msra.mxu0 %v556_v19 }
 0x54a   :  { %1874 = vmatprep.subr.mxu0 %v554_v20 }
 0x54b   :  { %1875 = vmatpush3.msra.mxu0 %v554_v20  ;;  %v857_v27 = vpop.permute.xlu1 %856 }
 0x54c   :  { %1879 = vmatprep.subr.mxu0 %v232_v21 }
 0x54d   :  { %v1980_v22 = vpop.eup %1979 }
 0x54e   :  { %v552_v25 = vmul.f32 %v1980_v22, %v1976_v11 }
 0x54f   :  { %v855_v32 = vpop.permute.xlu1 %854 }
 0x551   :  { %v1982_v23 = vpop.eup %1981 }
 0x552   :  { %v550_v24 = vmul.f32 %v1982_v23, %v1978_v13  ;;  %v1729_v13 = vld [vmem:[%s2393_s7 + $0x20] sm:$0xff] }
 0x554   :  { %1876 = vmatprep.mubr.msk.f32.mxu0 %vm239_vm1, %v550_v24 }
 0x555   :  { %1877 = vmatmul.mubr.msk.f32.vlgmr.msra.gmra.mxu0 %vm239_vm1, %v552_v25 }
 0x556   :  { %1880 = vmatpush3.msra.mxu0 %v232_v21 }
 0x557   :  { %1881 = vmatprep.subr.mxu0 %v231_v26 }
 0x558   :  { %1882 = vmatpush3.msra.mxu0 %v231_v26 }
 0x559   :  { %1893 = vmatprep.subr.msk.mxu0 %vm239_vm1, %v857_v27 }
 0x615   :  { %v1878_v29 = vpop.f32.mrf.mxu0 }
 0x617   :  { %v631_v30 = vpop.f32.mrf.mxu0 }
 0x618   :  { %1883 = vmatprep.mubr.msk.f32.mxu0 %vm239_vm1, %v631_v30 }
 0x619   :  { %1884 = vmatmul.mubr.msk.f32.vlgmr.msra.gmra.mxu0 %vm239_vm1, %v1878_v29 }
 0x61a   :  { %1894 = vmatpush3.xpose.msk.msra.mxu0 %vm239_vm1, %v857_v27  ;;  %1897 = vmatprep.mubr.msk.f32.mxu0 %vm239_vm1, %v2229_v31 }
 0x61b   :  { %1895 = vmatprep.subr.msk.mxu0 %vm239_vm1, %v855_v32 }
 0x61e   :  { %1896 = vmatpush3.xpose.msk.msra.mxu0 %vm239_vm1, %v855_v32 }
 0x621   :  { %1898 = vmatmul.mubr.msk.f32.vlgmr.msra.gmra.mxu0 %vm239_vm1, %v2239_v33 }
 0x6d9   :  { %v1885_v40 = vpop.f32.mrf.mxu0 }
 0x6da   :  { %v799_v41 = vadd.f32 %v1892_v39, %v1885_v40 }
 0x6db   :  { %v2259_v43 = vpop.f32.mrf.mxu0 }
 0x6dc   :  { %v2257_v42 = vadd.f32 %v2254_v38, %v799_v41  ;;  %v794_v27 = vadd.f32 %v793_v14, %v2259_v43  ;;  %v845_v14 = vsub.s32 3, %v2243_v35 }
 0x6de   :  { %v806_v28 = vadd.f32 %v2254_v38, %v794_v27 }
 0x6e0   :  { %v808_v29 = vadd.f32 %v806_v28, %v2107_v2 }
 0x6e1   :  { %v1899_v44 = vpop.f32.mrf.mxu0 }
 0x6e2   :  { %v944_v45 = vmul.f32 0.25, %v1899_v44  ;;  %v810_v30 = vsel %vm55_vm0, %v808_v29, 0.0 }
 0x6e3   :  { %v934_v46 = vpop.f32.mrf.mxu0 }
 0x6e4   :  { %v943_v47 = vmul.f32 0.25, %v934_v46  ;;  %v946_v48 = vadd.f32 %v944_v45, %v2151_v18 }
 0x6e6   :  { %v950_v49 = vsel %vm239_vm1, %v946_v48, -inf  ;;  %v945_v50 = vadd.f32 %v943_v47, %v2146_v15 }
 0x6e7   :  { %951 = vmax.xlane.f32.xlu1 %v950_v49  ;;  %v809_v49 = vadd.f32 %v2257_v42, %v2120_v5 }
 0x6e8   :  { %v947_v51 = vsel %vm239_vm1, %v945_v50, -inf }
 0x6e9   :  { %948 = vmax.xlane.f32.xlu0 %v947_v51 }
 0x6f8   :  { %971 = vrot.lane.b32.xlu1 %v2239_v33, %s2033_s3 }
 0x6fc   :  { %1062 = vrot.lane.b32.xlu1 %v2127_v8, %s2039_s11 }
 0x700   :  { %1060 = vrot.lane.b32.xlu1 %v2129_v10, %s2039_s11 }
 0x704   :  { %1058 = vrot.lane.b32.xlu1 %v2239_v33, %s2035_s21 }
 0x770   :  { %v952_v52 = vpop.xlane.xlu1 %951 }
 0x771   :  { %v954_v53 = vsub.f32 %v946_v48, %v952_v52 }
 0x772   :  { %v949_v54 = vpop.xlane.xlu0 %948 }
 0x773   :  { %v957_v55 = vmul.f32 1.442695, %v954_v53  ;;  %v953_v56 = vsub.f32 %v945_v50, %v949_v54  ;;  %v813_v50 = vsel %vm55_vm0, %v809_v49, 0.0 }
 0x774   :  { %v972_v57 = vpop.permute.xlu1 %971 }
 0x775   :  { %1983 = vpow2.f32 %v957_v55  ;;  %v955_v58 = vmul.f32 1.442695, %v953_v56  ;;  %1900 = vmatprep.subr.mxu1 %v972_v57 }
 0x776   :  { %1901 = vmatpush3.msra.mxu1 %v972_v57 }
 0x777   :  { %1985 = vpow2.f32 %v955_v58 }
 0x778   :  { %v1063_v0 = vpop.permute.xlu1 %1062 }
 0x77c   :  { %v1061_v9 = vpop.permute.xlu1 %1060 }
 0x780   :  { %v1059_v11 = vpop.permute.xlu1 %1058 }
 0x782   :  { %v1984_v59 = vpop.eup %1983 }
 0x783   :  { %v962_v60 = vsel %vm239_vm1, %v1984_v59, 0.0 }
 0x784   :  { %v1986_v8 = vpop.eup %1985  ;;  %963 = vadd.xlane.f32.xlu0 %v962_v60  ;;  %v1732_v60 = vld [vmem:[%s2393_s7 + $0x38] sm:$0xff] }
 0x785   :  { %v959_v10 = vsel %vm239_vm1, %v1986_v8, 0.0 }
 0x788   :  { %960 = vadd.xlane.f32.xlu0 %v959_v10 }
 0x79e   :  { %969 = vrot.lane.b32.xlu0 %v2229_v31, %s2033_s3 }
 0x7a2   :  { %1056 = vrot.lane.b32.xlu0 %v2229_v31, %s2035_s21 }
 0x80d   :  { %v964_v61 = vpop.xlane.xlu0 %963 }
 0x80e   :  { %1987 = vrcp.f32 %v964_v61 }
 0x811   :  { %v961_v62 = vpop.xlane.xlu0 %960 }
 0x812   :  { %1989 = vrcp.f32 %v961_v62 }
 0x815   :  { %v970_v63 = vpop.permute.xlu0 %969 }
 0x816   :  { %1902 = vmatprep.subr.mxu1 %v970_v63 }
 0x817   :  { %1903 = vmatpush3.msra.mxu1 %v970_v63 }
 0x818   :  { %1907 = vmatprep.subr.msk.mxu1 %vm239_vm1, %v1063_v0 }
 0x819   :  { %v1057_v7 = vpop.permute.xlu0 %1056 }
 0x81b   :  { %v1988_v1 = vpop.eup %1987 }
 0x81c   :  { %v968_v6 = vmul.f32 %v1988_v1, %v1984_v59 }
 0x81f   :  { %v1990_v3 = vpop.eup %1989 }
 0x820   :  { %v966_v4 = vmul.f32 %v1990_v3, %v1986_v8  ;;  %v1731_v8 = vld [vmem:[%s2393_s7 + $0x30] sm:$0xff] }
 0x822   :  { %1904 = vmatprep.mubr.msk.f32.mxu1 %vm239_vm1, %v966_v4 }
 0x823   :  { %1905 = vmatmul.mubr.msk.f32.vlgmr.msra.gmra.mxu1 %vm239_vm1, %v968_v6 }
 0x824   :  { %1908 = vmatpush3.xpose.msk.msra.mxu1 %vm239_vm1, %v1063_v0  ;;  %1911 = vmatprep.mubr.msk.f32.mxu1 %vm239_vm1, %v1057_v7  ;;  %v839_v7 = vsub.s32 2, %v2243_v35 }
 0x825   :  { %1909 = vmatprep.subr.msk.mxu1 %vm239_vm1, %v1061_v9 }
 0x828   :  { %1910 = vmatpush3.xpose.msk.msra.mxu1 %vm239_vm1, %v1061_v9 }
 0x829   :  { %1928 = vmatprep.subr.mxu1 %v1730_v12 }
 0x82b   :  { %1912 = vmatmul.mubr.msk.f32.vlgmr.msra.gmra.mxu1 %vm239_vm1, %v1059_v11  ;;  %v1424_v11 = vsub.s32 1, %v2243_v35 }
 0x82c   :  { %1929 = vmatpush3.msra.mxu1 %v1730_v12 }
 0x82d   :  { %1930 = vmatprep.subr.mxu1 %v1729_v13 }
 0x82e   :  { %1931 = vmatpush3.msra.mxu1 %v1729_v13  ;;  %v840_v13 = vrot.slane %v2249_v37, %v839_v7  ;;  %v1474_v7 = vsub.s32 6, %v2243_v35 }
 0x8e3   :  { %v1906_v16 = vpop.f32.mrf.mxu1 }
 0x8e5   :  { %v1047_v17 = vpop.f32.mrf.mxu1 }
 0x8e6   :  { %1932 = vmatprep.mubr.msk.f32.mxu1 %vm239_vm1, %v1047_v17 }
 0x8e7   :  { %1933 = vmatmul.mubr.msk.f32.vlgmr.msra.gmra.mxu1 %vm239_vm1, %v1906_v16 }
 0x8eb   :  { %v1913_v19 = vpop.f32.mrf.mxu1 }
 0x8ec   :  { %v1148_v20 = vmul.f32 0.25, %v1913_v19  ;;  %v1425_v19 = vrot.slane %v2249_v37, %v1424_v11 }
 0x8ed   :  { %v1138_v21 = vpop.f32.mrf.mxu1 }
 0x8ee   :  { %v1147_v22 = vmul.f32 0.25, %v1138_v21  ;;  %v1150_v23 = vadd.f32 %v1148_v20, %v2151_v18 }
 0x8f0   :  { %v1154_v24 = vsel %vm239_vm1, %v1150_v23, -inf  ;;  %v1149_v25 = vadd.f32 %v1147_v22, %v2146_v15 }
 0x8f1   :  { %1155 = vmax.xlane.f32.xlu1 %v1154_v24 }
 0x8f2   :  { %v1151_v26 = vsel %vm239_vm1, %v1149_v25, -inf }
 0x8f3   :  { %1152 = vmax.xlane.f32.xlu0 %v1151_v26 }
 0x902   :  { %1175 = vrot.lane.b32.xlu1 %v2239_v33, %s2036_s5 }
 0x926   :  { %811 = vadd.xlane.f32.xlu1 %v810_v30 }
 0x97a   :  { %v1156_v18 = vpop.xlane.xlu1 %1155 }
 0x97b   :  { %v1158_v32 = vsub.f32 %v1150_v23, %v1156_v18  ;;  %v846_v23 = vrot.slane %v2249_v37, %v845_v14 }
 0x97c   :  { %v1153_v34 = vpop.xlane.xlu0 %1152 }
 0x97d   :  { %v1161_v15 = vmul.f32 1.442695, %v1158_v32  ;;  %v1157_v39 = vsub.f32 %v1149_v25, %v1153_v34 }
 0x97e   :  { %v1176_v40 = vpop.permute.xlu1 %1175 }
 0x97f   :  { %1991 = vpow2.f32 %v1161_v15  ;;  %v1159_v41 = vmul.f32 1.442695, %v1157_v39  ;;  %1914 = vmatprep.subr.mxu0 %v1176_v40 }
 0x980   :  { %1915 = vmatpush3.msra.mxu0 %v1176_v40 }
 0x981   :  { %1993 = vpow2.f32 %v1159_v41 }
 0x98c   :  { %v1992_v33 = vpop.eup %1991 }
 0x98d   :  { %v1166_v43 = vsel %vm239_vm1, %v1992_v33, 0.0 }
 0x98e   :  { %v1994_v38 = vpop.eup %1993  ;;  %1167 = vadd.xlane.f32.xlu0 %v1166_v43 }
 0x98f   :  { %v1163_v2 = vsel %vm239_vm1, %v1994_v38, 0.0 }
 0x992   :  { %1164 = vadd.xlane.f32.xlu0 %v1163_v2 }
 0x9a7   :  { %v1934_v17 = vpop.f32.mrf.mxu1 }
 0x9a8   :  { %1173 = vrot.lane.b32.xlu0 %v2229_v31, %s2036_s5 }
 0x9a9   :  { %v1413_v25 = vpop.f32.mrf.mxu1 }
 0x9af   :  { %v812_v44 = vpop.xlane.xlu1 %811 }
 0x9b0   :  { %v817_v45 = vmul.f32 0.03125, %v812_v44 }
 0x9b2   :  { %v819_v46 = vsub.f32 %v808_v29, %v817_v45 }
 0x9b4   :  { %v821_v47 = vmul.f32 %v819_v46, %v819_v46 }
 0x9b6   :  { %v823_v48 = vsel %vm55_vm0, %v821_v47, 0.0 }
 0x9b7   :  { %824 = vadd.xlane.f32.xlu1 %v823_v48  ;;  %v1471_v48 = vld [vmem:[%s2394_s8 + $0x18] sm:$0xff] }
 0x9c7   :  { %814 = vadd.xlane.f32.xlu0 %v813_v50  ;;  %v1469_v50 = vld [vmem:[%s2394_s8 + $0x8] sm:$0xff] }
 0xa17   :  { %v1168_v51 = vpop.xlane.xlu0 %1167 }
 0xa18   :  { %1995 = vrcp.f32 %v1168_v51  ;;  %v1468_v51 = vld [vmem:[%s2394_s8] sm:$0xff] }
 0xa1b   :  { %v1165_v52 = vpop.xlane.xlu0 %1164 }
 0xa1c   :  { %1997 = vrcp.f32 %v1165_v52 }
 0xa1f   :  { %v1174_v53 = vpop.permute.xlu0 %1173 }
 0xa20   :  { %1916 = vmatprep.subr.mxu0 %v1174_v53 }
 0xa21   :  { %1917 = vmatpush3.msra.mxu0 %v1174_v53 }
 0xa22   :  { %1921 = vmatprep.subr.mxu0 %v1732_v60 }
 0xa25   :  { %v1996_v31 = vpop.eup %1995 }
 0xa26   :  { %v1172_v56 = vmul.f32 %v1996_v31, %v1992_v33 }
 0xa29   :  { %v1998_v54 = vpop.eup %1997 }
 0xa2a   :  { %v1170_v55 = vmul.f32 %v1998_v54, %v1994_v38 }
 0xa2c   :  { %1918 = vmatprep.mubr.msk.f32.mxu0 %vm239_vm1, %v1170_v55 }
 0xa2d   :  { %1919 = vmatmul.mubr.msk.f32.vlgmr.msra.gmra.mxu0 %vm239_vm1, %v1172_v56 }
 0xa2e   :  { %1922 = vmatpush3.msra.mxu0 %v1732_v60 }
 0xa2f   :  { %1923 = vmatprep.subr.mxu0 %v1731_v8 }
 0xa30   :  { %1924 = vmatpush3.msra.mxu0 %v1731_v8 }
 0xa31   :  { %1935 = vmatprep.subr.mxu0 %v1471_v48 }
 0xa40   :  { %v825_v63 = vpop.xlane.xlu1 %824 }
 0xa41   :  { %v829_v1 = vmul.f32 0.03125, %v825_v63 }
 0xa43   :  { %v831_v4 = vadd.f32 1e-05, %v829_v1  ;;  %v1754_v1 = vld [vmem:[%s2394_s8 + $0x38] sm:$0xff] }
 0xa44   :  { %1946 = vmatprep.subr.mxu1 %v1754_v1 }
 0xa45   :  { %1947 = vmatpush3.msra.mxu1 %v1754_v1 }
 0xa50   :  { %v815_v57 = vpop.xlane.xlu0 %814 }
 0xa51   :  { %v818_v5 = vmul.f32 0.03125, %v815_v57  ;;  %v1458_v57 = vsub.s32 4, %v2243_v35 }
 0xa53   :  { %v820_v42 = vsub.f32 %v809_v49, %v818_v5  ;;  %v1470_v49 = vld [vmem:[%s2394_s8 + $0x10] sm:$0xff] }
 0xa55   :  { %v822_v58 = vmul.f32 %v820_v42, %v820_v42 }
 0xa57   :  { %v826_v59 = vsel %vm55_vm0, %v822_v58, 0.0  ;;  %v1464_v58 = vsub.s32 5, %v2243_v35 }
 0xa58   :  { %827 = vadd.xlane.f32.xlu0 %v826_v59 }
 0xae1   :  { %v828_v62 = vpop.xlane.xlu0 %827 }
 0xae2   :  { %v830_v0 = vmul.f32 0.03125, %v828_v62 }
 0xae4   :  { %v832_v3 = vadd.f32 1e-05, %v830_v0 }
 0xae6   :  { %1999 = vrsqrt.f32 %v832_v3  ;;  %v1753_v3 = vld [vmem:[%s2394_s8 + $0x30] sm:$0xff] }
 0xae7   :  { %2001 = vrsqrt.f32 %v831_v4  ;;  %1948 = vmatprep.subr.mxu1 %v1753_v3  ;;  %v1752_v4 = vld [vmem:[%s2394_s8 + $0x28] sm:$0xff] }
 0xae8   :  { %1949 = vmatpush3.msra.mxu1 %v1753_v3 }
 0xae9   :  { %1950 = vmatprep.subr.mxu1 %v1752_v4 }
 0xaea   :  { %1951 = vmatpush3.msra.mxu1 %v1752_v4 }
 0xaed   :  { %v1920_v10 = vpop.f32.mrf.mxu0 }
 0xaef   :  { %v1251_v61 = vpop.f32.mrf.mxu0 }
 0xaf0   :  { %1925 = vmatprep.mubr.msk.f32.mxu0 %vm239_vm1, %v1251_v61  ;;  %v1465_v61 = vrot.slane %v2249_v37, %v1464_v58 }
 0xaf1   :  { %1926 = vmatmul.mubr.msk.f32.vlgmr.msra.gmra.mxu0 %vm239_vm1, %v1920_v10 }
 0xaf2   :  { %1936 = vmatpush3.msra.mxu0 %v1471_v48 }
 0xaf3   :  { %v2000_v6 = vpop.eup %1999  ;;  %1937 = vmatprep.subr.mxu0 %v1470_v49 }
 0xaf4   :  { %v2002_v9 = vpop.eup %2001  ;;  %v836_v12 = vmul.f32 %v2000_v6, %v820_v42  ;;  %1938 = vmatpush3.msra.mxu0 %v1470_v49  ;;  %v1459_v42 = vrot.slane %v2249_v37, %v1458_v57  ;;  %v1751_v6 = vld [vmem:[%s2394_s8 + $0x20] sm:$0xff] }
 0xaf5   :  { %v835_v16 = vmul.f32 %v2002_v9, %v819_v46  ;;  %1939 = vmatprep.subr.mxu0 %v1469_v50  ;;  %1952 = vmatprep.subr.mxu1 %v1751_v6  ;;  %v1475_v9 = vrot.slane %v2249_v37, %v1474_v7 }
 0xaf6   :  { %v842_v20 = vmul.f32 %v840_v13, %v836_v12  ;;  %1940 = vmatpush3.msra.mxu0 %v1469_v50  ;;  %1953 = vmatpush3.msra.mxu1 %v1751_v6 }
 0xaf7   :  { %v841_v24 = vmul.f32 %v840_v13, %v835_v16  ;;  %1941 = vmatprep.subr.mxu0 %v1468_v51 }
 0xaf8   :  { %v848_v29 = vadd.f32 %v846_v23, %v842_v20  ;;  %1942 = vmatpush3.msra.mxu0 %v1468_v51  ;;  %v1566_v20 = vsub.s32 7, %v2243_v35 }
 0xaf9   :  { %v847_v32 = vadd.f32 %v846_v23, %v841_v24 }
 0xbb1   :  { %v1927_v21 = vpop.f32.mrf.mxu0 }
 0xbb2   :  { %v1419_v22 = vadd.f32 %v1934_v17, %v1927_v21  ;;  %v1567_v21 = vrot.slane %v2249_v37, %v1566_v20 }
 0xbb3   :  { %v1332_v26 = vpop.f32.mrf.mxu0 }
 0xbb4   :  { %v1427_v27 = vadd.f32 %v1425_v19, %v1419_v22  ;;  %v1414_v28 = vadd.f32 %v1413_v25, %v1332_v26 }
 0xbb6   :  { %v1426_v30 = vadd.f32 %v1425_v19, %v1414_v28  ;;  %v1429_v18 = vadd.f32 %v1427_v27, %v848_v29 }
 0xbb8   :  { %v1433_v34 = vsel %vm55_vm0, %v1429_v18, 0.0  ;;  %v1428_v15 = vadd.f32 %v1426_v30, %v847_v32 }
 0xbb9   :  { %1434 = vadd.xlane.f32.xlu0 %v1433_v34 }
 0xbba   :  { %v1430_v39 = vsel %vm55_vm0, %v1428_v15, 0.0 }
 0xbbb   :  { %1431 = vadd.xlane.f32.xlu1 %v1430_v39 }
 0xc42   :  { %v1435_v40 = vpop.xlane.xlu0 %1434 }
 0xc43   :  { %v1437_v41 = vmul.f32 0.03125, %v1435_v40 }
 0xc44   :  { %v1432_v33 = vpop.xlane.xlu1 %1431 }
 0xc45   :  { %v1439_v43 = vsub.f32 %v1429_v18, %v1437_v41  ;;  %v1436_v38 = vmul.f32 0.03125, %v1432_v33 }
 0xc47   :  { %v1438_v2 = vsub.f32 %v1428_v15, %v1436_v38  ;;  %v1441_v44 = vmul.f32 %v1439_v43, %v1439_v43 }
 0xc49   :  { %v1445_v45 = vsel %vm55_vm0, %v1441_v44, 0.0  ;;  %v1440_v46 = vmul.f32 %v1438_v2, %v1438_v2 }
 0xc4a   :  { %1446 = vadd.xlane.f32.xlu0 %v1445_v45 }
 0xc4b   :  { %v1442_v47 = vsel %vm55_vm0, %v1440_v46, 0.0 }
 0xc4c   :  { %1443 = vadd.xlane.f32.xlu1 %v1442_v47  ;;  %v43_v47 = vld [vmem:[%s2395_s9 + $0x8] sm:$0x3]  ;;  %s2011_s9 = scalar_lea.vmem %s1697_s30, 256 }
 0xc4d   :  { %v1680_v48 = vrot.slane %v43_v47, %v804_v36  ;;  %v1686_v50 = vrot.slane %v43_v47, %v1424_v11  ;;  %p2012_p0 = scmp.ne.s32.totalorder %s1697_s30, %s2011_s9  ;;  %p2017_p2 = scmp.lt.s32.totalorder %s2011_s9, %s2011_s9 }
 0xc4f   :  { %p2018_p3 = por %p2017_p2, %p2016_p1 }
 0xc51   :  { %p2019_p4 = pnand %p2018_p3, %p2012_p0 }
 0xcd3   :  { %v1447_v52 = vpop.xlane.xlu0 %1446 }
 0xcd4   :  { %v1449_v53 = vmul.f32 0.03125, %v1447_v52 }
 0xcd5   :  { %v1444_v31 = vpop.xlane.xlu1 %1443 }
 0xcd6   :  { %v1451_v54 = vadd.f32 1e-05, %v1449_v53  ;;  %v1448_v55 = vmul.f32 0.03125, %v1444_v31 }
 0xcd8   :  { %2003 = vrsqrt.f32 %v1451_v54  ;;  %v1450_v56 = vadd.f32 1e-05, %v1448_v55 }
 0xcda   :  { %2005 = vrsqrt.f32 %v1450_v56 }
 0xce5   :  { %v2004_v5 = vpop.eup %2003 }
 0xce6   :  { %v1455_v59 = vmul.f32 %v2004_v5, %v1439_v43 }
 0xce7   :  { %v2006_v60 = vpop.eup %2005 }
 0xce8   :  { %v1454_v8 = vmul.f32 %v2006_v60, %v1438_v2  ;;  %v1461_v10 = vmul.f32 %v1459_v42, %v1455_v59 }
 0xcea   :  { %v1460_v62 = vmul.f32 %v1459_v42, %v1454_v8  ;;  %v1467_v0 = vadd.f32 %v1465_v61, %v1461_v10 }
 0xcec   :  { %v1466_v63 = vadd.f32 %v1465_v61, %v1460_v62 }
 0xcee   :  { %1943 = vmatprep.mubr.msk.f32.mxu0 %vm55_vm0, %v1466_v63 }
 0xcef   :  { %1944 = vmatmul.mubr.msk.f32.vlgmr.msra.gmra.mxu0 %vm55_vm0, %v1467_v0 }
 0xdaf   :  { %v1945_v12 = vpop.f32.mrf.mxu0 }
 0xdb0   :  { %v1554_v13 = vadd.f32 %v1945_v12, %v1475_v9 }
 0xdb1   :  { %v1548_v14 = vpop.f32.mrf.mxu0 }
 0xdb2   :  { %v1549_v16 = vadd.f32 %v1548_v14, %v1475_v9  ;;  %v1558_v19 = vmax.f32 %v1554_v13, 0.0 }
 0xdb4   :  { %v1557_v17 = vmax.f32 %v1549_v16, 0.0 }
 0xdb6   :  { %1954 = vmatprep.mubr.msk.f32.mxu1 %vm55_vm0, %v1557_v17 }
 0xdb7   :  { %1955 = vmatmul.mubr.msk.f32.vlgmr.msra.gmra.mxu1 %vm55_vm0, %v1558_v19 }
 0xe77   :  { %v1956_v22 = vpop.f32.mrf.mxu1 }
 0xe78   :  { %v1646_v23 = vadd.f32 %v1956_v22, %v1567_v21 }
 0xe79   :  { %v1640_v24 = vpop.f32.mrf.mxu1 }
 0xe7a   :  { %v1641_v25 = vadd.f32 %v1640_v24, %v1567_v21  ;;  %v1650_v26 = vadd.f32 %v1646_v23, %v1467_v0 }
 0xe7c   :  { %v1654_v27 = vsel %vm55_vm0, %v1650_v26, 0.0  ;;  %v1649_v28 = vadd.f32 %v1641_v25, %v1466_v63 }
 0xe7d   :  { %1655 = vadd.xlane.f32.xlu0 %v1654_v27 }
 0xe7e   :  { %v1651_v29 = vsel %vm55_vm0, %v1649_v28, 0.0 }
 0xe7f   :  { %1652 = vadd.xlane.f32.xlu1 %v1651_v29 }
 0xf06   :  { %v1656_v30 = vpop.xlane.xlu0 %1655 }
 0xf07   :  { %v1658_v18 = vmul.f32 0.03125, %v1656_v30 }
 0xf08   :  { %v1653_v32 = vpop.xlane.xlu1 %1652 }
 0xf09   :  { %v1660_v34 = vsub.f32 %v1650_v26, %v1658_v18  ;;  %v1657_v15 = vmul.f32 0.03125, %v1653_v32 }
 0xf0b   :  { %v1659_v39 = vsub.f32 %v1649_v28, %v1657_v15  ;;  %v1662_v40 = vmul.f32 %v1660_v34, %v1660_v34 }
 0xf0d   :  { %v1666_v37 = vsel %vm55_vm0, %v1662_v40, 0.0  ;;  %v1661_v41 = vmul.f32 %v1659_v39, %v1659_v39 }
 0xf0e   :  { %1667 = vadd.xlane.f32.xlu0 %v1666_v37 }
 0xf0f   :  { %v1663_v33 = vsel %vm55_vm0, %v1661_v41, 0.0 }
 0xf10   :  { %1664 = vadd.xlane.f32.xlu1 %v1663_v33 }
 0xf97   :  { %v1668_v43 = vpop.xlane.xlu0 %1667 }
 0xf98   :  { %v1670_v38 = vmul.f32 0.03125, %v1668_v43 }
 0xf99   :  { %v1665_v2 = vpop.xlane.xlu1 %1664 }
 0xf9a   :  { %v1672_v44 = vadd.f32 1e-05, %v1670_v38  ;;  %v1669_v45 = vmul.f32 0.03125, %v1665_v2 }
 0xf9c   :  { %2007 = vrsqrt.f32 %v1672_v44  ;;  %v1671_v46 = vadd.f32 1e-05, %v1669_v45 }
 0xf9e   :  { %2009 = vrsqrt.f32 %v1671_v46 }
 0xfa9   :  { %v2008_v49 = vpop.eup %2007 }
 0xfaa   :  { %v1676_v51 = vmul.f32 %v2008_v49, %v1660_v34 }
 0xfab   :  { %v2010_v52 = vpop.eup %2009 }
 0xfac   :  { %v1675_v53 = vmul.f32 %v2010_v52, %v1659_v39  ;;  %v1682_v31 = vmul.f32 %v1680_v48, %v1676_v51 }
 0xfae   :  { %v1681_v54 = vmul.f32 %v1680_v48, %v1675_v53  ;;  %v1688_v55 = vadd.f32 %v1686_v50, %v1682_v31 }
 0xfb0   :  { %v1687_v56 = vadd.f32 %v1686_v50, %v1681_v54  ;;  %1690 = vst.msk [vmem:[#allocation2 + $0x8] sm:$0xff] %vm55_vm0, %v1688_v55 }
 0xfb2   :  { %1689 = vst.msk [vmem:[#allocation2] sm:$0xff] %vm55_vm0, %v1687_v56 }
 0xfb3   :  { %2022 = shalt.err (!%p2019_p4)
}
 0xfb4   :  { %s2041_s11 = smov 128   ;;  %s2042_s3 = smov 8  }
 0xfb5   :  { %1702 = dma.vmem_to_hbm [thread:$0]  %s1697_s30, 256, %s2396_s10, [#allocation3], %s2041_s11, %s2041_s11, %s2042_s3  }
 0xfb6   :  { %2031 = dma.done.wait [#allocation3], 256  }
 0xfb7   :  { %2032 = vsyncadd [#allocation3], 4294967040 }
 0xfb8   :  { %1706 = vsyncpa [#allocation3], 1 }

</bundles_post_ra>
